<compile_context>
chip_gen: v5e
topology: v5e:2x2
jax: 0.10.0
libtpu: 0.0.40
codegen_flags: <defaults>
</compile_context>

<pallas_src>
import jax
import jax.numpy as jnp
import numpy as np
from jax.experimental import pallas as pl
from jax.experimental.pallas import tpu as pltpu


def _round_up(a, b):
    return ((a + b - 1) // b) * b


def _make_kernel(compute_dtype):
    """TGCN(H0=0) + Linear(H,1) on one row-block of nodes."""

    def kernel(ahat_ref, x_ref, wf_ref, bf_ref, w2_ref, b2_ref, out_ref):
        f32 = jnp.float32
        hdim = w2_ref.shape[0]                                   # H (unpadded)

        # Feature transform for ALL nodes: (N, F) @ (F, 2H).  Tiny vs the propagation matmul
        # (ratio F/TILE_N), so recomputing it per row-block keeps the kernel self-contained and
        # safe under "parallel" megacore sharding (no cross-step scratch dependence).
        xw = jnp.dot(
            x_ref[...].astype(compute_dtype),
            wf_ref[...].astype(compute_dtype),
            preferred_element_type=f32,
        )                                                        # (N, 2H) f32

        # Dominant matmul, lane-dense RHS: (TILE_N, N) @ (N, 2H) on the MXU.
        gates = jnp.dot(
            ahat_ref[...].astype(compute_dtype),
            xw.astype(compute_dtype),
            preferred_element_type=f32,
        ) + bf_ref[...]                                          # (TILE_N, 2H)

        # H0 = 0  =>  z = sigmoid(conv_z @ Wz_top + bz),  h_tilde = tanh(conv_h @ Wh_top + bh),
        #             h = (1 - z) * h_tilde   (r gate and all H0 terms are exactly zero).
        z = jax.nn.sigmoid(gates[:, :hdim])
        h_tilde = jnp.tanh(gates[:, hdim:])
        h = (1.0 - z) * h_tilde                                  # (TILE_N, H)

        # forward(): relu(h) is computed then discarded (y = h), so no relu here.
        out_ref[...] = jnp.dot(h, w2_ref[...], preferred_element_type=f32) + b2_ref[...]

    return kernel


def build_ahat(edge_index, num_nodes):
    """Improved-GCN normalized dense adjacency.  Depends only on the graph -> build once,
    reuse across forward calls (hoisted out of the per-step path per the perf review)."""
    src = edge_index[0]
    dst = edge_index[1]
    a = jnp.zeros((num_nodes, num_nodes), jnp.float32).at[dst, src].add(1.0)
    a = a + 2.0 * jnp.eye(num_nodes, dtype=jnp.float32)          # improved=True: self-loop weight 2
    deg = a.sum(axis=1)
    dinv = jnp.where(deg > 0, jax.lax.rsqrt(deg), 0.0)
    return dinv[:, None] * a * dinv[None, :]                     # ahat[t, s] = d_t^-1/2 * w * d_s^-1/2


def fuse_params(params):
    """Fold GCNConv weights into the top half of the gate Linears (exact; H0 terms are zero).
    r-gate params and the bottom halves of lwz/lwh are algebraically eliminated."""
    hdim = params["w2"].shape[0]
    wz_f = params["wz"] @ params["lwz"][:hdim]                   # (F, H)
    bz_f = params["bz"] @ params["lwz"][:hdim] + params["lbz"]   # (1, H)
    wh_f = params["wh"] @ params["lwh"][:hdim]                   # (F, H)
    bh_f = params["bh"] @ params["lwh"][:hdim] + params["lbh"]   # (1, H)
    wf = jnp.concatenate([wz_f, wh_f], axis=1)                   # (F, 2H)
    bf = jnp.concatenate([bz_f, bh_f], axis=1)                   # (1, 2H)
    return wf, bf, params["w2"], params["b2"]


def tgcn_linear2_pallas(x, ahat, wf, bf, w2, b2, *, tile_n=256, compute_dtype=jnp.float32):
    """x: (N, F) f32; ahat: (N, N) f32 normalized adjacency.  Returns (N, 1) f32."""
    n, f_in = x.shape
    two_h = wf.shape[1]

    # Row-block tile: multiple of 8 (sublane), padded grid if N is ragged.
    tile_n = _round_up(max(8, min(tile_n, n)), 8)
    n_pad = _round_up(n, tile_n)
    ahat_p = ahat if n_pad == n else jnp.zeros((n_pad, n), ahat.dtype).at[:n].set(ahat)
    grid = (pl.cdiv(n_pad, tile_n),)

    out = pl.pallas_call(
        _make_kernel(compute_dtype),
        out_shape=jax.ShapeDtypeStruct((n_pad, 1), jnp.float32),
        grid=grid,
        in_specs=[
            pl.BlockSpec((tile_n, n), lambda i: (i, 0)),         # adjacency rows: streamed / pipelined
            pl.BlockSpec((n, f_in), lambda i: (0, 0)),           # full x, resident across steps
            pl.BlockSpec((f_in, two_h), lambda i: (0, 0)),       # fused gate weight
            pl.BlockSpec((1, two_h), lambda i: (0, 0)),          # fused gate bias
            pl.BlockSpec((w2.shape[0], 1), lambda i: (0, 0)),    # linear2 weight
            pl.BlockSpec((1, 1), lambda i: (0, 0)),              # linear2 bias
        ],
        out_specs=pl.BlockSpec((tile_n, 1), lambda i: (i, 0)),
        compiler_params=pltpu.CompilerParams(
            dimension_semantics=("parallel",),                   # shard row blocks across TCs (v7x)
            vmem_limit_bytes=64 * 1024 * 1024,                   # <= physical on v5e/v6e/v7x
        ),
    )(ahat_p, x, wf, bf, w2, b2)
    return out[:n]


def recurrent_gcn_forward(x, edge_index, params, num_nodes, *, tile_n=256,
                          compute_dtype=jnp.float32):
    """Drop-in convenience wrapper.  For hot loops, hoist build_ahat/fuse_params and call
    tgcn_linear2_pallas directly (adjacency + fused weights don't change per step)."""
    ahat = build_ahat(edge_index, num_nodes)
    wf, bf, w2, b2 = fuse_params(params)
    return tgcn_linear2_pallas(x, ahat, wf, bf, w2, b2, tile_n=tile_n,
                               compute_dtype=compute_dtype)


def init_params(key, node_features, hidden):
    # Full TGCN parameter set (incl. r gate) to mirror the PyTorch module; the r-gate and
    # H0-dependent halves are provably inert in this forward and never reach the kernel.
    ks = jax.random.split(key, 14)
    s = 0.1
    f32 = jnp.float32
    return {
        "wz": s * jax.random.normal(ks[0], (node_features, hidden), f32),
        "bz": s * jax.random.normal(ks[1], (1, hidden), f32),
        "wr": s * jax.random.normal(ks[2], (node_features, hidden), f32),
        "br": s * jax.random.normal(ks[3], (1, hidden), f32),
        "wh": s * jax.random.normal(ks[4], (node_features, hidden), f32),
        "bh": s * jax.random.normal(ks[5], (1, hidden), f32),
        "lwz": s * jax.random.normal(ks[6], (2 * hidden, hidden), f32),
        "lbz": s * jax.random.normal(ks[7], (1, hidden), f32),
        "lwr": s * jax.random.normal(ks[8], (2 * hidden, hidden), f32),
        "lbr": s * jax.random.normal(ks[9], (1, hidden), f32),
        "lwh": s * jax.random.normal(ks[10], (2 * hidden, hidden), f32),
        "lbh": s * jax.random.normal(ks[11], (1, hidden), f32),
        "w2": s * jax.random.normal(ks[12], (hidden, 1), f32),
        "b2": s * jax.random.normal(ks[13], (1, 1), f32),
    }


def _reference_forward(x, edge_index, params, num_nodes):
    """Pure-JAX reference of the un-simplified TGCN cell (with r gate and H0=0) + linear2."""
    hdim = params["w2"].shape[0]
    ahat = build_ahat(edge_index, num_nodes)
    ax = ahat @ x
    conv_z = ax @ params["wz"] + params["bz"]
    conv_r = ax @ params["wr"] + params["br"]
    conv_h = ax @ params["wh"] + params["bh"]
    h0 = jnp.zeros((num_nodes, hdim), jnp.float32)
    z = jax.nn.sigmoid(jnp.concatenate([conv_z, h0], 1) @ params["lwz"] + params["lbz"])
    r = jax.nn.sigmoid(jnp.concatenate([conv_r, h0], 1) @ params["lwr"] + params["lbr"])
    h_tilde = jnp.tanh(jnp.concatenate([conv_h, h0 * r], 1) @ params["lwh"] + params["lbh"])
    h = z * h0 + (1.0 - z) * h_tilde
    return h @ params["w2"] + params["b2"]


if __name__ == "__main__":
    N, F_IN, HID = 16, 8, 32
    key = jax.random.PRNGKey(0)
    k_x, k_p = jax.random.split(key)

    x = jax.random.normal(k_x, (N, F_IN), jnp.float32)

    # simple undirected ring graph (both directions), no explicit self-loops
    i = jnp.arange(N, dtype=jnp.int32)
    j = (i + 1) % N
    edge_index = jnp.stack([jnp.concatenate([i, j]), jnp.concatenate([j, i])])  # (2, 2N)

    params = init_params(k_p, F_IN, HID)

    # Hoisted (reusable across forward calls): graph normalization + weight fusion.
    ahat = build_ahat(edge_index, N)
    wf, bf, w2, b2 = fuse_params(params)

    # tile_n=8 => grid=(2,) so the row-block pipeline/parallel path is exercised even at N=16.
    y = tgcn_linear2_pallas(x, ahat, wf, bf, w2, b2, tile_n=8)
    jax.block_until_ready(y)
    assert y.shape == (N, 1) and y.dtype == jnp.float32

    # Correctness check against the un-simplified pure-JAX TGCN reference.
    y_ref = _reference_forward(x, edge_index, params, N)
    np.testing.assert_allclose(np.asarray(y), np.asarray(y_ref), rtol=1e-4, atol=1e-5)

    # Convenience wrapper path (same result).
    y2 = recurrent_gcn_forward(x, edge_index, params, N, tile_n=8)
    np.testing.assert_allclose(np.asarray(y2), np.asarray(y_ref), rtol=1e-4, atol=1e-5)

    print("KERNEL_OK")
</pallas_src>

<mosaic_0001>
module attributes {stable_mosaic.version = 11 : i64} {
  func.func @kernel(%arg0: i32, %arg1: memref<8x16xf32, #tpu.memory_space<vmem>>, %arg2: memref<16x8xf32, #tpu.memory_space<vmem>>, %arg3: memref<8x64xf32, #tpu.memory_space<vmem>>, %arg4: memref<1x64xf32, #tpu.memory_space<vmem>>, %arg5: memref<32x1xf32, #tpu.memory_space<vmem>>, %arg6: memref<1x1xf32, #tpu.memory_space<vmem>>, %arg7: memref<8x1xf32, #tpu.memory_space<vmem>>) attributes {dimension_semantics = [#tpu.dimension_semantics<parallel>], iteration_bounds = array<i64: 2>, scalar_prefetch = 0 : i64, scratch_operands = 0 : i64, tpu.core_type = #tpu.core_type<tc>, window_params = [{transform_indices = @transform_0, window_bounds = array<i64: 8, 16>}, {pipeline_mode = #tpu.pipeline_mode<synchronous>, transform_indices = @transform_1, window_bounds = array<i64: 16, 8>}, {pipeline_mode = #tpu.pipeline_mode<synchronous>, transform_indices = @transform_2, window_bounds = array<i64: 8, 64>}, {pipeline_mode = #tpu.pipeline_mode<synchronous>, transform_indices = @transform_3, window_bounds = array<i64: 1, 64>}, {pipeline_mode = #tpu.pipeline_mode<synchronous>, transform_indices = @transform_4, window_bounds = array<i64: 32, 1>}, {pipeline_mode = #tpu.pipeline_mode<synchronous>, transform_indices = @transform_5, window_bounds = array<i64: 1, 1>}, {transform_indices = @transform_6, window_bounds = array<i64: 8, 1>}]} {
    %c0 = arith.constant 0 : index
    %c0_0 = arith.constant 0 : index
    %0 = vector.load %arg2[%c0, %c0_0] : memref<16x8xf32, #tpu.memory_space<vmem>>, vector<16x8xf32>
    %c0_1 = arith.constant 0 : index
    %c0_2 = arith.constant 0 : index
    %1 = vector.load %arg3[%c0_1, %c0_2] : memref<8x64xf32, #tpu.memory_space<vmem>>, vector<8x64xf32>
    %cst = arith.constant dense<0.000000e+00> : vector<16x64xf32>
    %2 = tpu.matmul %0, %1, %cst {dimension_numbers = #tpu.dot_dimension_numbers<[1], [0], [0], [1], [0, 0, 1, 1], [], []>} : vector<16x8xf32>, vector<8x64xf32>, vector<16x64xf32> -> vector<16x64xf32>
    %c0_3 = arith.constant 0 : index
    %c0_4 = arith.constant 0 : index
    %3 = vector.load %arg1[%c0_3, %c0_4] : memref<8x16xf32, #tpu.memory_space<vmem>>, vector<8x16xf32>
    %cst_5 = arith.constant dense<0.000000e+00> : vector<8x64xf32>
    %4 = tpu.matmul %3, %2, %cst_5 {dimension_numbers = #tpu.dot_dimension_numbers<[1], [0], [0], [1], [0, 0, 1, 1], [], []>} : vector<8x16xf32>, vector<16x64xf32>, vector<8x64xf32> -> vector<8x64xf32>
    %c0_6 = arith.constant 0 : index
    %c0_7 = arith.constant 0 : index
    %5 = vector.load %arg4[%c0_6, %c0_7] : memref<1x64xf32, #tpu.memory_space<vmem>>, vector<1x64xf32>
    %6 = vector.broadcast %5 : vector<1x64xf32> to vector<8x64xf32>
    %7 = arith.addf %4, %6 : vector<8x64xf32>
    %8 = vector.extract_strided_slice %7 {offsets = [0, 0], sizes = [8, 32], strides = [1, 1]} : vector<8x64xf32> to vector<8x32xf32>
    %9 = arith.negf %8 : vector<8x32xf32>
    %10 = math.exp %9 : vector<8x32xf32>
    %cst_8 = arith.constant 1.000000e+00 : f32
    %11 = vector.broadcast %cst_8 : f32 to vector<8x32xf32>
    %12 = arith.addf %11, %10 : vector<8x32xf32>
    %13 = arith.divf %11, %12 : vector<8x32xf32>
    %14 = vector.extract_strided_slice %7 {offsets = [0, 32], sizes = [8, 32], strides = [1, 1]} : vector<8x64xf32> to vector<8x32xf32>
    %15 = math.tanh %14 : vector<8x32xf32>
    %cst_9 = arith.constant 1.000000e+00 : f32
    %16 = vector.broadcast %cst_9 : f32 to vector<8x32xf32>
    %17 = arith.subf %16, %13 : vector<8x32xf32>
    %18 = arith.mulf %17, %15 : vector<8x32xf32>
    %c0_10 = arith.constant 0 : index
    %c0_11 = arith.constant 0 : index
    %19 = vector.load %arg5[%c0_10, %c0_11] : memref<32x1xf32, #tpu.memory_space<vmem>>, vector<32x1xf32>
    %cst_12 = arith.constant dense<0.000000e+00> : vector<8x1xf32>
    %20 = tpu.matmul %18, %19, %cst_12 {dimension_numbers = #tpu.dot_dimension_numbers<[1], [0], [0], [1], [0, 0, 1, 1], [], []>} : vector<8x32xf32>, vector<32x1xf32>, vector<8x1xf32> -> vector<8x1xf32>
    %c0_13 = arith.constant 0 : index
    %c0_14 = arith.constant 0 : index
    %21 = vector.load %arg6[%c0_13, %c0_14] : memref<1x1xf32, #tpu.memory_space<vmem>>, vector<1x1xf32>
    %22 = vector.broadcast %21 : vector<1x1xf32> to vector<8x1xf32>
    %23 = arith.addf %20, %22 : vector<8x1xf32>
    %c0_15 = arith.constant 0 : index
    %c0_16 = arith.constant 0 : index
    %24 = vector.load %arg7[%c0_15, %c0_16] : memref<8x1xf32, #tpu.memory_space<vmem>>, vector<8x1xf32>
    tpu.vector_store %arg7[%c0_15, %c0_16], %23 {strides = array<i32>} : memref<8x1xf32, #tpu.memory_space<vmem>>, vector<8x1xf32>,
    return
  }
  func.func @transform_0(%arg0: i32) -> (i32, i32) {
    %c0_i32 = arith.constant 0 : i32
    %c0_i32_0 = arith.constant 0 : i32
    return %arg0, %c0_i32 : i32, i32
  }
  func.func @transform_1(%arg0: i32) -> (i32, i32) {
    %c0_i32 = arith.constant 0 : i32
    %c0_i32_0 = arith.constant 0 : i32
    %c0_i32_1 = arith.constant 0 : i32
    return %c0_i32, %c0_i32_0 : i32, i32
  }
  func.func @transform_2(%arg0: i32) -> (i32, i32) {
    %c0_i32 = arith.constant 0 : i32
    %c0_i32_0 = arith.constant 0 : i32
    %c0_i32_1 = arith.constant 0 : i32
    return %c0_i32, %c0_i32_0 : i32, i32
  }
  func.func @transform_3(%arg0: i32) -> (i32, i32) {
    %c0_i32 = arith.constant 0 : i32
    %c0_i32_0 = arith.constant 0 : i32
    %c0_i32_1 = arith.constant 0 : i32
    return %c0_i32, %c0_i32_0 : i32, i32
  }
  func.func @transform_4(%arg0: i32) -> (i32, i32) {
    %c0_i32 = arith.constant 0 : i32
    %c0_i32_0 = arith.constant 0 : i32
    %c0_i32_1 = arith.constant 0 : i32
    return %c0_i32, %c0_i32_0 : i32, i32
  }
  func.func @transform_5(%arg0: i32) -> (i32, i32) {
    %c0_i32 = arith.constant 0 : i32
    %c0_i32_0 = arith.constant 0 : i32
    %c0_i32_1 = arith.constant 0 : i32
    return %c0_i32, %c0_i32_0 : i32, i32
  }
  func.func @transform_6(%arg0: i32) -> (i32, i32) {
    %c0_i32 = arith.constant 0 : i32
    %c0_i32_0 = arith.constant 0 : i32
    return %arg0, %c0_i32 : i32, i32
  }
}

</mosaic_0001>

<bundles_post_ra>
// kernel: tpu_custom_call.1
= control target key start
LH: loop header
LB: loop body
LE: loop exit
PB: predicated region body
PF: predicated region fallthrough
CT: control target
= control target key end

     0   :  { %s503_s23 = smov 0   ;;  %s551_s0 = inlined_call_operand.vmem [shape: f32[16,16], index: 0, kind: input, shape index: {}]   ;;  %s552_s1 = inlined_call_operand.vmem [shape: f32[16,8], index: 1, kind: input, shape index: {}]   ;;  %s553_s2 = inlined_call_operand.vmem [shape: f32[8,64], index: 2, kind: input, shape index: {}]   ;;  %s554_s3 = inlined_call_operand.vmem [shape: f32[1,64], index: 3, kind: input, shape index: {}]   ;;  %s555_s4 = inlined_call_operand.vmem [shape: f32[32,1], index: 4, kind: input, shape index: {}]   ;;  %s556_s5 = inlined_call_operand.<no memory space> [shape: f32[1,1], index: 5, kind: input, shape index: {}]   ;;  %s557_s6 = inlined_call_operand.vmem [shape: f32[16,1], index: 6, kind: output, shape index: {}]  }
   0x1   :  { %v11_v0 = vstv %s556_s5 }
   0x2   :  { %12 = vst [vmem:[#allocation2] sm:$0x1] %v11_v0 }
   0x3 LB: > { %s424_s24 = sadd.s32 4294967295, %s462_s23   ;;  %p428_p0 = scmp.ge.s32.totalorder %s462_s23, 1  ;;  %s462_s23 = sphi %s503_s23, %s18_s23  }
   0x4   : > { %p213_p1 = scmp.lt.s32.totalorder %s462_s23, 3 }
   0x6   : > { %p214_p2 = pnand %p428_p0, %p213_p1 }
   0x7   : > { %p241_p3 = scmp.lt.s32.totalorder (!%p214_p2), %s424_s24, 1  ;;  %s464_s16 = smov (!%p214_p2), 96  }
   0x8   : > { %217 = sbr.rel (%p214_p2) target bundleno = 537 (0x219), region = 44 }
   0xd   : > { %v251_v1 = vld [vmem:[%s553_s2] sm:$0xff]  ;;  %v250_v2 = vld [vmem:[%s552_s1 + $0x8] sm:$0xff]  ;;  %vm252_vm0 = vcmask 64512   ;;  %s559_s24 = smov (!%p241_p3, %s424_s24), 1  ;;  %vm287_vm1 = vcmask 130048   ;;  %v340_v7 = vld [vmem:[%s555_s4 + $0x18] sm:$0xff] }
   0xe   : > { %v249_v3 = vld [vmem:[%s552_s1] sm:$0xff]  ;;  %438 = vmatpush.msra.mxu3 %v251_v1  ;;  %274 = vmatpush.msra.mxu0 %v251_v1  ;;  %s429_s30 = sshll.u32 %s559_s24, 3  ;;  %v339_v8 = vld [vmem:[%s555_s4 + $0x10] sm:$0xff]  ;;  %v338_v16 = vld [vmem:[%s555_s4 + $0x8] sm:$0xff]  ;;  %vm345_vm6 = vcmask 261120   ;;  %vm369_vm7 = vcmask 7168  }
   0xf   : > { %432 = vmatmul.msk.f32.vlgmr.msra.gmra.mxu3 %vm252_vm0, %v250_v2  ;;  %431 = vmatmul.msk.f32.vlgmr.msra.gmra.mxu0 %vm252_vm0, %v249_v3  ;;  %s244_s9 = scalar_lea.vmem %s551_s0, %s429_s30  ;;  %v448_v9 = vld [vmem:[%s554_s3] ss:$0 sm:$0xff]  ;;  %s248_s25 = scalar_lea.vmem %s557_s6, %s429_s30 }
  0x10   : > { %v282_v6 = vld [vmem:[%s244_s9] sm:$0xff]  ;;  %361 = vmatpush.msra.mxu2 %v340_v7 }
  0x11   : > { %v337_v17 = vld [vmem:[%s555_s4] sm:$0xff] }
  0x12   : > { %362 = vmatpush.msra.mxu2 %v339_v8  ;;  %v449_v31 = vld [vmem:[#allocation2] ss:$0 sm:$0xff] }
  0x14   : > { %363 = vmatpush.msra.mxu2 %v338_v16 }
  0x16   : > { %364 = vmatpush.msra.mxu2 %v337_v17 }
  0x8c   : > { %v276_v5 = vpop.f32.mrf.mxu0 }
  0x92   : > { %v279_v4 = vpop.f32.mrf.mxu3 }
  0x93   : > { %305 = vmatpush.msra.mxu1 %v279_v4 }
  0x95   : > { %306 = vmatpush.msra.mxu1 %v276_v5 }
  0x96   : > { %433 = vmatmul.msk.f32.vlgmr.msra.gmra.mxu1 %vm287_vm1, %v282_v6 }
 0x113   : > { %v308_v10 = vpop.f32.mrf.mxu1 }
 0x114   : > { %v309_v11 = vadd.f32 %v448_v9, %v308_v10 }
 0x116   : > { %450 = vtanh.f32 %v309_v11  ;;  %v434_v13 = vmul.f32 -1.442695, %v309_v11 }
 0x118   : > { %452 = vpow2.f32 %v434_v13 }
 0x11c   : > { %v451_v12 = vpop.eup %450 }
 0x11d   : > { %333 = vrot.lane.b32.xlu0 %v451_v12, %s464_s16 }
 0x11e   : > { %v453_v14 = vpop.eup %452 }
 0x11f   : > { %v314_v15 = vadd.f32 1.0, %v453_v14 }
 0x121   : > { %454 = vrcp.f32 %v314_v15  ;;  %v326_v23 = vand.u32 2147483648, %v314_v15  ;;  %vm320_vm3 = vweird.f32 %v314_v15  ;;  %v324_v24 = vand.u32 2147483647, %v314_v15 }
 0x123   : > { %v327_v26 = vor.u32 1.1754944e-38, %v326_v23  ;;  %vm325_vm5 = vcmp.eq.f32.partialorder %v324_v24, 8.507059e+37 }
 0x127   : > { %v455_v18 = vpop.eup %454 }
 0x128   : > { %v316_v19 = vmul.f32 %v455_v18, %v314_v15  ;;  %vm321_vm2 = vweird.f32 %v455_v18 }
 0x129   : > { %vm322_vm4 = vmor %vm320_vm3, %vm321_vm2 }
 0x12a   : > { %v317_v20 = vsub.f32 1.0, %v316_v19 }
 0x12c   : > { %v318_v21 = vmul.f32 %v455_v18, %v317_v20 }
 0x12e   : > { %v319_v22 = vadd.f32 %v455_v18, %v318_v21 }
 0x130   : > { %v323_v25 = vsel %vm322_vm4, %v455_v18, %v319_v22 }
 0x131   : > { %v328_v27 = vsel %vm325_vm5, %v327_v26, %v323_v25 }
 0x132   : > { %v331_v28 = vsub.f32 1.0, %v328_v27 }
 0x18f   : > { %v334_v29 = vpop.permute.xlu0 %333 }
 0x190   : > { %v336_v30 = vmul.f32 %v334_v29, %v331_v28 }
 0x192   : > { %435 = vmatmul.msk.f32.vlgmr.msra.gmra.mxu2 %vm345_vm6, %v336_v30 }
 0x215   : > { %v366_v32 = vpop.f32.mrf.mxu2 }
 0x216   : > { %v367_v33 = vadd.f32 %v449_v31, %v366_v32 }
 0x218   : > { %370 = vst.msk [vmem:[%s248_s25] sm:$0xff] %vm369_vm7, %v367_v33 }
 0x219 PF: > { %s18_s23 = sadd.s32 1, %s462_s23  }
 0x21a   : > { %p15_p4 = scmp.ge.s32.totalorder %s18_s23, 4  }
 0x21c   :  { %17 = sbr.rel (!%p15_p4) target bundleno = 3 (0x3), region = 74 }

</bundles_post_ra>
